<compile_context>
chip_gen: v7x
topology: tpu7x:2x2x1
jax: 0.10.0
libtpu: 0.0.40
codegen_flags: <defaults>
</compile_context>

<pallas_src>
import jax
import jax.numpy as jnp
from jax.experimental import pallas as pl
from jax.experimental.pallas import tpu as pltpu


def mlp_kernel(x_ref, w1_ref, b1_ref, w2_ref, b2_ref,
               w3_ref, b3_ref, w4_ref, b4_ref, o_ref):
    x = x_ref[...]                                   # (TB, 5) f32

    # --- Linear(5, 512) on the VPU: 5 broadcast FMAs (K=5 is too thin for the MXU)
    h = x[:, 0:1] * w1_ref[0:1, :]
    for k in range(1, 5):                            # static unroll, K=5
        h = h + x[:, k:k + 1] * w1_ref[k:k + 1, :]
    h = h + b1_ref[...]
    # Dropout(eval: identity) + LeakyReLU(0.01); cast once to bf16 for the MXU.
    h = jnp.maximum(h, 0.01 * h).astype(jnp.bfloat16)

    # --- Linear(512, 256): bf16 MXU inputs, f32 accumulation; bf16 bias+ReLU epilogue
    h = jnp.dot(h, w2_ref[...], preferred_element_type=jnp.float32)
    h = jnp.maximum(h.astype(jnp.bfloat16) + b2_ref[...], 0)

    # --- Linear(256, 128): bf16 MXU inputs, f32 accumulation; bf16 bias+ReLU epilogue
    h = jnp.dot(h, w3_ref[...], preferred_element_type=jnp.float32)
    h = jnp.maximum(h.astype(jnp.bfloat16) + b3_ref[...], 0)

    # --- Linear(128, 8): 8-lane f32 output written directly (32 B/row, no padding)
    o_ref[...] = jnp.dot(h, w4_ref[...],
                         preferred_element_type=jnp.float32) + b4_ref[...]


def _prepare_kernel_params(params):
    """Cast parameters once in the wrapper (not per grid step)."""
    w1 = params["w1"].astype(jnp.float32)            # VPU path stays f32
    b1 = params["b1"].astype(jnp.float32)
    w2 = params["w2"].astype(jnp.bfloat16)           # MXU layers in bf16
    b2 = params["b2"].astype(jnp.bfloat16)           # bf16 epilogue
    w3 = params["w3"].astype(jnp.bfloat16)
    b3 = params["b3"].astype(jnp.bfloat16)
    w4 = params["w4"].astype(jnp.bfloat16)           # (128, 8) — no padding
    b4 = params["b4"].astype(jnp.float32)            # (1, 8), added to f32 output
    return w1, b1, w2, b2, w3, b3, w4, b4


def _round_up(n, m):
    return ((n + m - 1) // m) * m


def _hw_defaults():
    """Pick (tile_b, vmem_limit_bytes) per TPU generation (fallback = v7x-safe)."""
    try:
        vmem_phys = pltpu.get_tpu_info().vmem_capacity_bytes
    except Exception:
        vmem_phys = 64 << 20                         # conservative: assume v7x
    if vmem_phys >= (100 << 20):                     # v5e / v6e: 128 MiB VMEM
        return 4096, 64 << 20
    return 2048, 32 << 20                            # v7x: 64 MiB phys / 32 MiB scoped


def dnn_forward(x, params, *, tile_b=None, vmem_limit_bytes=None,
                small_batch_threshold=256):
    """x: (B, 5) float32 -> (B, 8) float32."""
    B = x.shape[0]
    weights = _prepare_kernel_params(params)

    dflt_tile, dflt_vmem = _hw_defaults()
    tile_b = dflt_tile if tile_b is None else tile_b
    vmem_limit_bytes = dflt_vmem if vmem_limit_bytes is None else vmem_limit_bytes

    if B <= small_batch_threshold:
        # Launch/latency-bound regime: single grid=() invocation, everything in VMEM.
        full = lambda a: pl.BlockSpec(a.shape, lambda: (0,) * a.ndim)
        return pl.pallas_call(
            mlp_kernel,
            out_shape=jax.ShapeDtypeStruct((B, 8), jnp.float32),
            grid=(),
            in_specs=[full(x)] + [full(a) for a in weights],
            out_specs=pl.BlockSpec((B, 8), lambda: (0, 0)),
            compiler_params=pltpu.CompilerParams(vmem_limit_bytes=32 << 20),
        )(x, *weights)

    # Large-batch path: tile the batch, keep weights resident, pipeline x/out DMAs.
    tile_b = _round_up(min(tile_b, _round_up(B, 8)), 8)
    n_tiles = pl.cdiv(B, tile_b)
    if n_tiles > 1 and n_tiles % 2 == 1:
        # Prefer an even tile count so v7x's two TensorCores split the grid evenly.
        tile_b = _round_up(pl.cdiv(B, n_tiles + 1), 8)
        n_tiles = pl.cdiv(B, tile_b)
    pad_b = n_tiles * tile_b
    xp = x if pad_b == B else jnp.pad(x, ((0, pad_b - B), (0, 0)))

    resident = lambda a: pl.BlockSpec(a.shape, lambda i: (0,) * a.ndim)
    out = pl.pallas_call(
        mlp_kernel,
        out_shape=jax.ShapeDtypeStruct((pad_b, 8), jnp.float32),
        grid=(n_tiles,),
        in_specs=[pl.BlockSpec((tile_b, 5), lambda i: (i, 0))]
                 + [resident(a) for a in weights],
        out_specs=pl.BlockSpec((tile_b, 8), lambda i: (i, 0)),
        compiler_params=pltpu.CompilerParams(
            dimension_semantics=("parallel",),       # megacore shard on v7x
            vmem_limit_bytes=vmem_limit_bytes),
    )(xp, *weights)
    return out if pad_b == B else out[:B]


def dnn_reference(x, params):
    """Pure-JAX reference using the same mixed-precision scheme as the kernel."""
    bf = lambda a: a.astype(jnp.bfloat16)
    h = x @ params["w1"] + params["b1"]
    h = bf(jnp.maximum(h, 0.01 * h))
    h = jnp.dot(h, bf(params["w2"]), preferred_element_type=jnp.float32)
    h = jnp.maximum(bf(h) + bf(params["b2"]), 0)
    h = jnp.dot(h, bf(params["w3"]), preferred_element_type=jnp.float32)
    h = jnp.maximum(bf(h) + bf(params["b3"]), 0)
    return jnp.dot(h, bf(params["w4"]),
                   preferred_element_type=jnp.float32) + params["b4"]


def init_params(key):
    """Mirrors nn.Linear default init; weights stored as (in, out), biases (1, out)."""
    sizes = [(5, 512), (512, 256), (256, 128), (128, 8)]
    params = {}
    keys = jax.random.split(key, 2 * len(sizes))
    for idx, (fan_in, fan_out) in enumerate(sizes):
        kw, kb = keys[2 * idx], keys[2 * idx + 1]
        bound = 1.0 / jnp.sqrt(fan_in)
        params[f"w{idx + 1}"] = jax.random.uniform(kw, (fan_in, fan_out),
                                                   jnp.float32, -bound, bound)
        params[f"b{idx + 1}"] = jax.random.uniform(kb, (1, fan_out),
                                                   jnp.float32, -bound, bound)
    return params


if __name__ == "__main__":
    key = jax.random.PRNGKey(0)
    k_params, k_small, k_big = jax.random.split(key, 3)
    params = init_params(k_params)

    # Small batch -> grid=() fast path.
    x_small = jax.random.normal(k_small, (16, 5), jnp.float32)
    out_small = dnn_forward(x_small, params)
    jax.block_until_ready(out_small)
    assert out_small.shape == (16, 8) and out_small.dtype == jnp.float32

    # Larger (non-multiple) batch -> tiled, pipelined, megacore-parallel path.
    x_big = jax.random.normal(k_big, (1500, 5), jnp.float32)
    out_big = dnn_forward(x_big, params, tile_b=512, small_batch_threshold=64)
    jax.block_until_ready(out_big)
    assert out_big.shape == (1500, 8) and out_big.dtype == jnp.float32

    # Numeric check against the pure-JAX reference (same mixed precision).
    ref_small = dnn_reference(x_small, params)
    ref_big = dnn_reference(x_big, params)
    assert jnp.allclose(out_small, ref_small, rtol=2e-2, atol=2e-2)
    assert jnp.allclose(out_big, ref_big, rtol=2e-2, atol=2e-2)

    print("KERNEL_OK")
</pallas_src>

<mosaic_0001>
module attributes {stable_mosaic.version = 11 : i64} {
  func.func @mlp_kernel(%arg0: memref<16x5xf32, #tpu.memory_space<vmem>>, %arg1: memref<5x512xf32, #tpu.memory_space<vmem>>, %arg2: memref<1x512xf32, #tpu.memory_space<vmem>>, %arg3: memref<512x256xbf16, #tpu.memory_space<vmem>>, %arg4: memref<1x256xbf16, #tpu.memory_space<vmem>>, %arg5: memref<256x128xbf16, #tpu.memory_space<vmem>>, %arg6: memref<1x128xbf16, #tpu.memory_space<vmem>>, %arg7: memref<128x8xbf16, #tpu.memory_space<vmem>>, %arg8: memref<1x8xf32, #tpu.memory_space<vmem>>, %arg9: memref<16x8xf32, #tpu.memory_space<vmem>>) attributes {dimension_semantics = [], scalar_prefetch = 0 : i64, scratch_operands = 0 : i64, tpu.core_type = #tpu.core_type<tc>} {
    %c0 = arith.constant 0 : index
    %c0_0 = arith.constant 0 : index
    %0 = vector.load %arg0[%c0, %c0_0] : memref<16x5xf32, #tpu.memory_space<vmem>>, vector<16x5xf32>
    %1 = vector.extract_strided_slice %0 {offsets = [0, 0], sizes = [16, 1], strides = [1, 1]} : vector<16x5xf32> to vector<16x1xf32>
    %c0_1 = arith.constant 0 : index
    %c0_2 = arith.constant 0 : index
    %2 = vector.load %arg1[%c0_1, %c0_2] : memref<5x512xf32, #tpu.memory_space<vmem>>, vector<1x512xf32>
    %3 = vector.broadcast %1 : vector<16x1xf32> to vector<16x512xf32>
    %4 = vector.broadcast %2 : vector<1x512xf32> to vector<16x512xf32>
    %5 = arith.mulf %3, %4 : vector<16x512xf32>
    %6 = vector.extract_strided_slice %0 {offsets = [0, 1], sizes = [16, 1], strides = [1, 1]} : vector<16x5xf32> to vector<16x1xf32>
    %c1 = arith.constant 1 : index
    %c0_3 = arith.constant 0 : index
    %7 = vector.load %arg1[%c1, %c0_3] : memref<5x512xf32, #tpu.memory_space<vmem>>, vector<1x512xf32>
    %8 = vector.broadcast %6 : vector<16x1xf32> to vector<16x512xf32>
    %9 = vector.broadcast %7 : vector<1x512xf32> to vector<16x512xf32>
    %10 = arith.mulf %8, %9 : vector<16x512xf32>
    %11 = arith.addf %5, %10 : vector<16x512xf32>
    %12 = vector.extract_strided_slice %0 {offsets = [0, 2], sizes = [16, 1], strides = [1, 1]} : vector<16x5xf32> to vector<16x1xf32>
    %c2 = arith.constant 2 : index
    %c0_4 = arith.constant 0 : index
    %13 = vector.load %arg1[%c2, %c0_4] : memref<5x512xf32, #tpu.memory_space<vmem>>, vector<1x512xf32>
    %14 = vector.broadcast %12 : vector<16x1xf32> to vector<16x512xf32>
    %15 = vector.broadcast %13 : vector<1x512xf32> to vector<16x512xf32>
    %16 = arith.mulf %14, %15 : vector<16x512xf32>
    %17 = arith.addf %11, %16 : vector<16x512xf32>
    %18 = vector.extract_strided_slice %0 {offsets = [0, 3], sizes = [16, 1], strides = [1, 1]} : vector<16x5xf32> to vector<16x1xf32>
    %c3 = arith.constant 3 : index
    %c0_5 = arith.constant 0 : index
    %19 = vector.load %arg1[%c3, %c0_5] : memref<5x512xf32, #tpu.memory_space<vmem>>, vector<1x512xf32>
    %20 = vector.broadcast %18 : vector<16x1xf32> to vector<16x512xf32>
    %21 = vector.broadcast %19 : vector<1x512xf32> to vector<16x512xf32>
    %22 = arith.mulf %20, %21 : vector<16x512xf32>
    %23 = arith.addf %17, %22 : vector<16x512xf32>
    %24 = vector.extract_strided_slice %0 {offsets = [0, 4], sizes = [16, 1], strides = [1, 1]} : vector<16x5xf32> to vector<16x1xf32>
    %c4 = arith.constant 4 : index
    %c0_6 = arith.constant 0 : index
    %25 = vector.load %arg1[%c4, %c0_6] : memref<5x512xf32, #tpu.memory_space<vmem>>, vector<1x512xf32>
    %26 = vector.broadcast %24 : vector<16x1xf32> to vector<16x512xf32>
    %27 = vector.broadcast %25 : vector<1x512xf32> to vector<16x512xf32>
    %28 = arith.mulf %26, %27 : vector<16x512xf32>
    %29 = arith.addf %23, %28 : vector<16x512xf32>
    %c0_7 = arith.constant 0 : index
    %c0_8 = arith.constant 0 : index
    %30 = vector.load %arg2[%c0_7, %c0_8] : memref<1x512xf32, #tpu.memory_space<vmem>>, vector<1x512xf32>
    %31 = vector.broadcast %30 : vector<1x512xf32> to vector<16x512xf32>
    %32 = arith.addf %29, %31 : vector<16x512xf32>
    %cst = arith.constant 0.00999999977 : f32
    %33 = vector.broadcast %cst : f32 to vector<16x512xf32>
    %34 = arith.mulf %33, %32 : vector<16x512xf32>
    %35 = arith.maximumf %32, %34 : vector<16x512xf32>
    %36 = arith.truncf %35 : vector<16x512xf32> to vector<16x512xbf16>
    %c0_9 = arith.constant 0 : index
    %c0_10 = arith.constant 0 : index
    %37 = vector.load %arg3[%c0_9, %c0_10] : memref<512x256xbf16, #tpu.memory_space<vmem>>, vector<512x256xbf16>
    %cst_11 = arith.constant dense<0.000000e+00> : vector<16x256xf32>
    %38 = tpu.matmul %36, %37, %cst_11 {dimension_numbers = #tpu.dot_dimension_numbers<[1], [0], [0], [1], [0, 0, 1, 1], [], []>} : vector<16x512xbf16>, vector<512x256xbf16>, vector<16x256xf32> -> vector<16x256xf32>
    %39 = arith.truncf %38 : vector<16x256xf32> to vector<16x256xbf16>
    %c0_12 = arith.constant 0 : index
    %c0_13 = arith.constant 0 : index
    %40 = vector.load %arg4[%c0_12, %c0_13] : memref<1x256xbf16, #tpu.memory_space<vmem>>, vector<1x256xbf16>
    %41 = vector.broadcast %40 : vector<1x256xbf16> to vector<16x256xbf16>
    %42 = arith.addf %39, %41 : vector<16x256xbf16>
    %cst_14 = arith.constant 0.000000e+00 : bf16
    %43 = vector.broadcast %cst_14 : bf16 to vector<16x256xbf16>
    %44 = arith.maximumf %42, %43 : vector<16x256xbf16>
    %c0_15 = arith.constant 0 : index
    %c0_16 = arith.constant 0 : index
    %45 = vector.load %arg5[%c0_15, %c0_16] : memref<256x128xbf16, #tpu.memory_space<vmem>>, vector<256x128xbf16>
    %cst_17 = arith.constant dense<0.000000e+00> : vector<16x128xf32>
    %46 = tpu.matmul %44, %45, %cst_17 {dimension_numbers = #tpu.dot_dimension_numbers<[1], [0], [0], [1], [0, 0, 1, 1], [], []>} : vector<16x256xbf16>, vector<256x128xbf16>, vector<16x128xf32> -> vector<16x128xf32>
    %47 = arith.truncf %46 : vector<16x128xf32> to vector<16x128xbf16>
    %c0_18 = arith.constant 0 : index
    %c0_19 = arith.constant 0 : index
    %48 = vector.load %arg6[%c0_18, %c0_19] : memref<1x128xbf16, #tpu.memory_space<vmem>>, vector<1x128xbf16>
    %49 = vector.broadcast %48 : vector<1x128xbf16> to vector<16x128xbf16>
    %50 = arith.addf %47, %49 : vector<16x128xbf16>
    %cst_20 = arith.constant 0.000000e+00 : bf16
    %51 = vector.broadcast %cst_20 : bf16 to vector<16x128xbf16>
    %52 = arith.maximumf %50, %51 : vector<16x128xbf16>
    %c0_21 = arith.constant 0 : index
    %c0_22 = arith.constant 0 : index
    %53 = vector.load %arg7[%c0_21, %c0_22] : memref<128x8xbf16, #tpu.memory_space<vmem>>, vector<128x8xbf16>
    %cst_23 = arith.constant dense<0.000000e+00> : vector<16x8xf32>
    %54 = tpu.matmul %52, %53, %cst_23 {dimension_numbers = #tpu.dot_dimension_numbers<[1], [0], [0], [1], [0, 0, 1, 1], [], []>} : vector<16x128xbf16>, vector<128x8xbf16>, vector<16x8xf32> -> vector<16x8xf32>
    %c0_24 = arith.constant 0 : index
    %c0_25 = arith.constant 0 : index
    %55 = vector.load %arg8[%c0_24, %c0_25] : memref<1x8xf32, #tpu.memory_space<vmem>>, vector<1x8xf32>
    %56 = vector.broadcast %55 : vector<1x8xf32> to vector<16x8xf32>
    %57 = arith.addf %54, %56 : vector<16x8xf32>
    %c0_26 = arith.constant 0 : index
    %c0_27 = arith.constant 0 : index
    %58 = vector.load %arg9[%c0_26, %c0_27] : memref<16x8xf32, #tpu.memory_space<vmem>>, vector<16x8xf32>
    tpu.vector_store %arg9[%c0_26, %c0_27], %57 {strides = array<i32>} : memref<16x8xf32, #tpu.memory_space<vmem>>, vector<16x8xf32>,
    return
  }
}

</mosaic_0001>

<bundles_post_ra>
// kernel: tpu_custom_call.1
= control target key start
LH: loop header
LB: loop body
LE: loop exit
PB: predicated region body
PF: predicated region fallthrough
CT: control target
= control target key end

     0   :  { %14 = vsyncpa [#allocation3], 0  ;;  %s1707_s0 = inlined_call_operand.vmem [shape: f32[16,5], index: 0, kind: input, shape index: {}]   ;;  %s1708_s1 = inlined_call_operand.vmem [shape: f32[5,512], index: 1, kind: input, shape index: {}]   ;;  %s1709_s2 = inlined_call_operand.vmem [shape: f32[1,512], index: 2, kind: input, shape index: {}]   ;;  %s1710_s3 = inlined_call_operand.hbm [shape: bf16[512,256], index: 3, kind: input, shape index: {}]   ;;  %s1711_s4 = inlined_call_operand.vmem [shape: bf16[1,256], index: 4, kind: input, shape index: {}]   ;;  %s1712_s5 = inlined_call_operand.hbm [shape: bf16[256,128], index: 5, kind: input, shape index: {}]   ;;  %s1713_s6 = inlined_call_operand.vmem [shape: bf16[1,128], index: 6, kind: input, shape index: {}]   ;;  %s1714_s7 = inlined_call_operand.vmem [shape: bf16[128,8], index: 7, kind: input, shape index: {}]   ;;  %s1715_s8 = inlined_call_operand.vmem [shape: f32[1,8], index: 8, kind: input, shape index: {}]   ;;  %s1716_s9 = inlined_call_operand.vmem [shape: f32[16,8], index: 9, kind: output, shape index: {}]  }
   0x1   :  { %15 = vsyncpa [#allocation5], 0  ;;  %s1495_s30 = smov [#allocation2]   ;;  %s1447_s13 = scalar_lea.hbm %s1710_s3, 8192 }
   0x2   :  { %s27_s10 = sshll.u32 %s1495_s30, 4  ;;  %p1448_p0 = scmp.ne.s32.totalorder %s1710_s3, %s1447_s13  ;;  %s28_s10 = int_to_ptr.vmem [resolvable:$true] %s27_s10 }
   0x3   :  { %p1451_p1 = scmp.lt.u32.totalorder %s1447_s13, %s1710_s3 }
   0x5   :  { %p1453_p2 = pnand %p1451_p1, %p1448_p0 }
   0x7   :  { %1456 = shalt.err (!%p1453_p2)
}
   0x8   :  { %s1457_s18 = scalar_lea.vmem %s28_s10, 8192  ;;  %p1462_p4 = scmp.lt.s32.totalorder %s28_s10, %s28_s10 }
   0x9   :  { %p1458_p3 = scmp.ne.s32.totalorder %s28_s10, %s1457_s18  ;;  %p1463_p5 = scmp.lt.s32.totalorder %s1457_s18, %s1457_s18 }
   0xb   :  { %p1464_p6 = por %p1463_p5, %p1462_p4 }
   0xd   :  { %p1465_p7 = pnand %p1464_p6, %p1458_p3 }
   0xf   :  { %1468 = shalt.err (!%p1465_p7)
}
  0x10   :  { %s1496_s19 = smov 128   ;;  %s1497_s20 = smov 8  }
  0x11   :  { %33 = dma.hbm_to_vmem [thread:$0]  %s1710_s3, 8192, %s28_s10, [#allocation3], %s1496_s19, %s1496_s19, %s1497_s20  }
  0x12   :  { %s1498_s23 = smov [#allocation4]   ;;  %s1469_s27 = scalar_lea.hbm %s1712_s5, 2048 }
  0x13   :  { %s41_s24 = sshll.u32 %s1498_s23, 4  ;;  %p1470_p8 = scmp.ne.s32.totalorder %s1712_s5, %s1469_s27  ;;  %s42_s24 = int_to_ptr.vmem [resolvable:$true] %s41_s24 }
  0x14   :  { %p1473_p9 = scmp.lt.u32.totalorder %s1469_s27, %s1712_s5 }
  0x16   :  { %p1475_p10 = pnand %p1473_p9, %p1470_p8 }
  0x18   :  { %1478 = shalt.err (!%p1475_p10)
}
  0x19   :  { %s1479_s12 = scalar_lea.vmem %s42_s24, 2048  ;;  %p1484_p12 = scmp.lt.s32.totalorder %s42_s24, %s42_s24 }
  0x1a   :  { %p1480_p11 = scmp.ne.s32.totalorder %s42_s24, %s1479_s12  ;;  %p1485_p13 = scmp.lt.s32.totalorder %s1479_s12, %s1479_s12 }
  0x1c   :  { %p1486_p0 = por %p1485_p13, %p1484_p12 }
  0x1e   :  { %p1487_p1 = pnand %p1486_p0, %p1480_p11 }
  0x20   :  { %1490 = shalt.err (!%p1487_p1)
}
  0x21   :  { %s1499_s3 = smov 64   ;;  %s1500_s10 = smov 4  }
  0x22   :  { %47 = dma.hbm_to_vmem [thread:$0]  %s1712_s5, 2048, %s42_s24, [#allocation5], %s1499_s3, %s1499_s3, %s1500_s10  }
  0x23   :  { %1491 = dma.done.wait [#allocation3], 8192  }
  0x24   :  { %1492 = vsyncadd [#allocation3], 4294959104 }
  0x25   :  { %1493 = dma.done.wait [#allocation5], 2048  }
  0x26   :  { %1494 = vsyncadd [#allocation5], 4294965248  ;;  %v1501_v0 = vmov 1   ;;  %v1502_v1 = vmov 0   ;;  %v61_v2 = vld [vmem:[%s1707_s0] sm:$0xff]  ;;  %v62_v3 = vld [vmem:[%s1707_s0 + $0x8] sm:$0xff]  ;;  %v75_v48 = vlaneseq }
  0x27   :  { %1320 = vset.pattern.permute.xlu1 %v1501_v0  ;;  %1319 = vset.pattern.permute.xlu0 %v1502_v1  ;;  %v1327_v4 = vld [vmem:[#allocation2 + $0x4] ss:$8 sps:$4 sm:$0xff]   ;;  %v1329_v5 = vld [vmem:[#allocation2] ss:$8 sps:$4 sm:$0xff]   ;;  %v1330_v6 = vld [vmem:[#allocation2 + $0x14] ss:$8 sps:$4 sm:$0xff]  }
  0x28   :  { %106 = vperm.xlu1 %1320, %v61_v2   ;;  %66 = vperm.xlu0 %1319, %v61_v2   ;;  %v1332_v7 = vld [vmem:[#allocation2 + $0x10] ss:$8 sps:$4 sm:$0xff]   ;;  %v1333_v8 = vld [vmem:[#allocation2 + $0x24] ss:$8 sps:$4 sm:$0xff]   ;;  %v1335_v9 = vld [vmem:[#allocation2 + $0x20] ss:$8 sps:$4 sm:$0xff]  }
  0x29   :  { %725 = vmatprep.subr.bf16.mxu0 %v1327_v4  ;;  %v1503_v10 = vmov 2   ;;  %v1336_v11 = vld [vmem:[#allocation2 + $0x34] ss:$8 sps:$4 sm:$0xff]   ;;  %v1338_v12 = vld [vmem:[#allocation2 + $0x30] ss:$8 sps:$4 sm:$0xff]   ;;  %v1504_v14 = vmov 3  }
  0x2a   :  { %726 = vmatpush1.bf16.msra.mxu0 %v1329_v5  ;;  %v1339_v13 = vld [vmem:[#allocation2 + $0x44] ss:$8 sps:$4 sm:$0xff]   ;;  %v1341_v15 = vld [vmem:[#allocation2 + $0x40] ss:$8 sps:$4 sm:$0xff]   ;;  %v1342_v16 = vld [vmem:[#allocation2 + $0x54] ss:$8 sps:$4 sm:$0xff]  }
  0x2b   :  { %727 = vmatprep.subr.bf16.mxu0 %v1330_v6  ;;  %v1505_v17 = vmov 4   ;;  %v1344_v18 = vld [vmem:[#allocation2 + $0x50] ss:$8 sps:$4 sm:$0xff]   ;;  %v1345_v19 = vld [vmem:[#allocation2 + $0x64] ss:$8 sps:$4 sm:$0xff]   ;;  %v1590_v51 = vshrl.u32 %v75_v48, 7 }
  0x2c   :  { %110 = vperm.xlu1 %1320, %v62_v3   ;;  %71 = vperm.xlu0 %1319, %v62_v3   ;;  %v1347_v20 = vld [vmem:[#allocation2 + $0x60] ss:$8 sps:$4 sm:$0xff]   ;;  %v1348_v21 = vld [vmem:[#allocation2 + $0x74] ss:$8 sps:$4 sm:$0xff]   ;;  %v1350_v22 = vld [vmem:[#allocation2 + $0x70] ss:$8 sps:$4 sm:$0xff]  }
  0x2d   :  { %v1351_v23 = vld [vmem:[#allocation2 + $0x84] ss:$8 sps:$4 sm:$0xff]   ;;  %v1353_v24 = vld [vmem:[#allocation2 + $0x80] ss:$8 sps:$4 sm:$0xff]   ;;  %v1354_v25 = vld [vmem:[#allocation2 + $0x94] ss:$8 sps:$4 sm:$0xff]  }
  0x2e   :  { %728 = vmatpush1.bf16.msra.mxu0 %v1332_v7  ;;  %v1356_v26 = vld [vmem:[#allocation2 + $0x90] ss:$8 sps:$4 sm:$0xff]   ;;  %v1357_v27 = vld [vmem:[#allocation2 + $0xa4] ss:$8 sps:$4 sm:$0xff]   ;;  %v1359_v28 = vld [vmem:[#allocation2 + $0xa0] ss:$8 sps:$4 sm:$0xff]  }
  0x2f   :  { %729 = vmatprep.subr.bf16.mxu0 %v1333_v8  ;;  %v1360_v29 = vld [vmem:[#allocation2 + $0xb4] ss:$8 sps:$4 sm:$0xff]   ;;  %v1362_v30 = vld [vmem:[#allocation2 + $0xb0] ss:$8 sps:$4 sm:$0xff]   ;;  %v1363_v31 = vld [vmem:[#allocation2 + $0xc4] ss:$8 sps:$4 sm:$0xff]  }
  0x30   :  { %1322 = vset.pattern.permute.xlu1 %v1503_v10  ;;  %1321 = vset.pattern.permute.xlu0 %v1503_v10  ;;  %v1365_v32 = vld [vmem:[#allocation2 + $0xc0] ss:$8 sps:$4 sm:$0xff]   ;;  %v1366_v33 = vld [vmem:[#allocation2 + $0xd4] ss:$8 sps:$4 sm:$0xff]   ;;  %v1368_v34 = vld [vmem:[#allocation2 + $0xd0] ss:$8 sps:$4 sm:$0xff]  }
  0x31   :  { %157 = vperm.xlu1 %1322, %v62_v3   ;;  %153 = vperm.xlu0 %1321, %v61_v2   ;;  %v1369_v35 = vld [vmem:[#allocation2 + $0xe4] ss:$8 sps:$4 sm:$0xff]   ;;  %v1371_v36 = vld [vmem:[#allocation2 + $0xe0] ss:$8 sps:$4 sm:$0xff]   ;;  %v1372_v37 = vld [vmem:[#allocation2 + $0xf4] ss:$8 sps:$4 sm:$0xff]  }
  0x32   :  { %730 = vmatpush1.bf16.msra.mxu0 %v1335_v9  ;;  %v1374_v38 = vld [vmem:[#allocation2 + $0xf0] ss:$8 sps:$4 sm:$0xff]   ;;  %v1377_v39 = vld [vmem:[#allocation2 + $0x104] ss:$8 sps:$4 sm:$0xff]   ;;  %v85_v53 = vsub.s32 2, %v1590_v51  ;;  %v1600_v57 = vsub.s32 0, %v1590_v51 }
  0x33   :  { %731 = vmatprep.subr.bf16.mxu0 %v1336_v11  ;;  %v1423_v40 = vld [vmem:[#allocation4 + $0x40] sm:$0xff]   ;;  %v1425_v42 = vld [vmem:[#allocation4 + $0x48] sm:$0xff]   ;;  %v1427_v44 = vld [vmem:[#allocation4 + $0x50] sm:$0xff]   ;;  %v1603_v59 = vsub.s32 1, %v1590_v51  ;;  %v89_v60 = vsub.s32 3, %v1590_v51  ;;  %vm1508_vm0 = vmmov 0  }
  0x34   :  { %v1424_v41 = vld [vmem:[#allocation4] sm:$0xff]   ;;  %1250 = vmatprep.subr.bf16.mxu1 %v1423_v40  ;;  %v1426_v43 = vld [vmem:[#allocation4 + $0x8] sm:$0xff]   ;;  %v1428_v45 = vld [vmem:[#allocation4 + $0x10] sm:$0xff]   ;;  %vm1147_vm1 = vcmask 64512  }
  0x35   :  { %1323 = vset.pattern.permute.xlu1 %v1504_v14  ;;  %1324 = vset.pattern.permute.xlu0 %v1504_v14  ;;  %v1429_v46 = vld [vmem:[#allocation4 + $0x58] sm:$0xff]   ;;  %v1431_v49 = vld [vmem:[#allocation4 + $0x60] sm:$0xff]   ;;  %v1433_v52 = vld [vmem:[#allocation4 + $0x68] sm:$0xff]  }
  0x36   :  { %200 = vperm.xlu1 %1323, %v61_v2   ;;  %204 = vperm.xlu0 %1324, %v62_v3   ;;  %v1430_v47 = vld [vmem:[#allocation4 + $0x18] sm:$0xff]   ;;  %v1432_v50 = vld [vmem:[#allocation4 + $0x20] sm:$0xff]  }
  0x37   :  { %732 = vmatpush1.bf16.msra.mxu0 %v1338_v12  ;;  %1251 = vmatpush3.bf16.msra.mxu1 %v1424_v41  ;;  %v1156_v54 = vld [vmem:[%s1708_s1 + $0x1] ss:$8 sm:$0xf]  ;;  %v63_v55 = vld [vmem:[%s1708_s1] ss:$8 sm:$0xf] }
  0x38   :  { %733 = vmatprep.subr.bf16.mxu0 %v1339_v13  ;;  %1252 = vmatprep.subr.bf16.mxu1 %v1425_v42  ;;  %v125_v56 = vrot.slane %v1156_v54, %v85_v53  ;;  %v86_v58 = vrot.slane %v63_v55, %v85_v53  ;;  %v1157_v0 = vld [vmem:[%s1708_s1 + $0x2] ss:$8 sm:$0xf]  ;;  %v1158_v4 = vld [vmem:[%s1708_s1 + $0x3] ss:$8 sm:$0xf]  ;;  %v121_v5 = vrot.slane %v1156_v54, %v1603_v59 }
  0x39   :  { %v129_v6 = vrot.slane %v1156_v54, %v89_v60  ;;  %v78_v7 = vrot.slane %v63_v55, %v1600_v57  ;;  %v82_v8 = vrot.slane %v63_v55, %v1603_v59  ;;  %v90_v9 = vrot.slane %v63_v55, %v89_v60 }
  0x3a   :  { %1325 = vset.pattern.permute.xlu1 %v1505_v17  ;;  %1326 = vset.pattern.permute.xlu0 %v1505_v17  ;;  %v164_v13 = vrot.slane %v1157_v0, %v1600_v57  ;;  %v168_v14 = vrot.slane %v1157_v0, %v1603_v59  ;;  %v172_v17 = vrot.slane %v1157_v0, %v85_v53 }
  0x3b   :  { %247 = vperm.xlu1 %1325, %v61_v2   ;;  %734 = vmatpush1.bf16.msra.mxu0 %v1341_v15  ;;  %v117_v2 = vrot.slane %v1156_v54, %v1600_v57  ;;  %v1159_v15 = vld [vmem:[%s1708_s1 + $0x4] ss:$8 sm:$0xf] }
  0x3c   :  { %735 = vmatprep.subr.bf16.mxu0 %v1342_v16  ;;  %1253 = vmatpush3.bf16.msra.mxu1 %v1426_v43 }
  0x3d   :  { %1254 = vmatprep.subr.bf16.mxu1 %v1427_v44 }
  0x3f   :  { %251 = vperm.xlu1 %1325, %v62_v3   ;;  %736 = vmatpush1.bf16.msra.mxu0 %v1344_v18  ;;  %v176_v18 = vrot.slane %v1157_v0, %v89_v60 }
  0x40   :  { %737 = vmatprep.subr.bf16.mxu0 %v1345_v19  ;;  %1255 = vmatpush3.bf16.msra.mxu1 %v1428_v45  ;;  %v211_v19 = vrot.slane %v1158_v4, %v1600_v57 }
  0x41   :  { %1256 = vmatprep.subr.bf16.mxu1 %v1429_v46 }
  0x43   :  { %738 = vmatpush1.bf16.msra.mxu0 %v1347_v20 }
  0x44   :  { %739 = vmatprep.subr.bf16.mxu0 %v1348_v21  ;;  %1257 = vmatpush3.bf16.msra.mxu1 %v1430_v47  ;;  %v215_v21 = vrot.slane %v1158_v4, %v1603_v59 }
  0x45   :  { %1258 = vmatprep.subr.bf16.mxu1 %v1431_v49 }
  0x47   :  { %740 = vmatpush1.bf16.msra.mxu0 %v1350_v22  ;;  %v219_v22 = vrot.slane %v1158_v4, %v85_v53 }
  0x48   :  { %741 = vmatprep.subr.bf16.mxu0 %v1351_v23  ;;  %1259 = vmatpush3.bf16.msra.mxu1 %v1432_v50  ;;  %v223_v23 = vrot.slane %v1158_v4, %v89_v60 }
  0x49   :  { %1260 = vmatprep.subr.bf16.mxu1 %v1433_v52 }
  0x4b   :  { %742 = vmatpush1.bf16.msra.mxu0 %v1353_v24 }
  0x4c   :  { %743 = vmatprep.subr.bf16.mxu0 %v1354_v25 }
  0x4f   :  { %744 = vmatpush1.bf16.msra.mxu0 %v1356_v26 }
  0x50   :  { %745 = vmatprep.subr.bf16.mxu0 %v1357_v27  ;;  %v1624_v27 = vrot.slane %v1159_v15, %v1600_v57 }
  0x53   :  { %746 = vmatpush1.bf16.msra.mxu0 %v1359_v28 }
  0x54   :  { %747 = vmatprep.subr.bf16.mxu0 %v1360_v29 }
  0x57   :  { %748 = vmatpush1.bf16.msra.mxu0 %v1362_v30 }
  0x58   :  { %749 = vmatprep.subr.bf16.mxu0 %v1363_v31 }
  0x5b   :  { %750 = vmatpush1.bf16.msra.mxu0 %v1365_v32  ;;  %v291_v32 = vld [vmem:[%s1709_s2] sm:$0xf] }
  0x5c   :  { %751 = vmatprep.subr.bf16.mxu0 %v1366_v33  ;;  %v1637_v44 = vrot.slane %v291_v32, %v1600_v57  ;;  %v1639_v45 = vrot.slane %v291_v32, %v85_v53  ;;  %v1641_v46 = vrot.slane %v291_v32, %v89_v60 }
  0x5f   :  { %752 = vmatpush1.bf16.msra.mxu0 %v1368_v34 }
  0x60   :  { %753 = vmatprep.subr.bf16.mxu0 %v1369_v35 }
  0x63   :  { %754 = vmatpush1.bf16.msra.mxu0 %v1371_v36  ;;  %v1630_v36 = vrot.slane %v1159_v15, %v1603_v59 }
  0x64   :  { %755 = vmatprep.subr.bf16.mxu0 %v1372_v37  ;;  %v1632_v37 = vrot.slane %v1159_v15, %v85_v53 }
  0x67   :  { %756 = vmatpush1.bf16.msra.mxu0 %v1374_v38  ;;  %v1634_v38 = vrot.slane %v1159_v15, %v89_v60 }
  0x68   :  { %768 = vmatprep.subr.bf16.mxu0 %v1377_v39 }
  0xa7   :  { %v107_v61 = vpop.permute.xlu1 %106  ;;  %v67_v62 = vpop.permute.xlu0 %66 }
  0xa8   :  { %v136_v63 = vmul.f32 %v125_v56, %v107_v61  ;;  %v97_v3 = vmul.f32 %v86_v58, %v67_v62  ;;  %v134_v24 = vmul.f32 %v117_v2, %v107_v61  ;;  %v135_v25 = vmul.f32 %v121_v5, %v107_v61 }
  0xa9   :  { %v137_v26 = vmul.f32 %v129_v6, %v107_v61  ;;  %v95_v28 = vmul.f32 %v78_v7, %v67_v62  ;;  %v96_v29 = vmul.f32 %v82_v8, %v67_v62  ;;  %v98_v30 = vmul.f32 %v90_v9, %v67_v62 }
  0xaa   :  { %v144_v10 = vadd.f32 %v136_v63, %v97_v3 }
  0xab   :  { %v111_v11 = vpop.permute.xlu1 %110  ;;  %v72_v12 = vpop.permute.xlu0 %71  ;;  %v142_v47 = vadd.f32 %v134_v24, %v95_v28  ;;  %v143_v48 = vadd.f32 %v135_v25, %v96_v29  ;;  %v145_v49 = vadd.f32 %v137_v26, %v98_v30 }
  0xac   :  { %v140_v16 = vmul.f32 %v125_v56, %v111_v11  ;;  %v101_v20 = vmul.f32 %v86_v58, %v72_v12  ;;  %v138_v33 = vmul.f32 %v117_v2, %v111_v11  ;;  %v139_v39 = vmul.f32 %v121_v5, %v111_v11 }
  0xad   :  { %v99_v40 = vmul.f32 %v78_v7, %v72_v12  ;;  %v100_v41 = vmul.f32 %v82_v8, %v72_v12  ;;  %v141_v58 = vmul.f32 %v129_v6, %v111_v11  ;;  %v102_v61 = vmul.f32 %v90_v9, %v72_v12 }
  0xae   :  { %v148_v31 = vadd.f32 %v140_v16, %v101_v20 }
  0xaf   :  { %v146_v62 = vadd.f32 %v138_v33, %v99_v40  ;;  %v147_v63 = vadd.f32 %v139_v39, %v100_v41  ;;  %v149_v25 = vadd.f32 %v141_v58, %v102_v61 }
  0xb0   :  { %v158_v34 = vpop.permute.xlu1 %157  ;;  %v154_v35 = vpop.permute.xlu0 %153 }
  0xb1   :  { %v187_v42 = vmul.f32 %v172_v17, %v158_v34  ;;  %v183_v43 = vmul.f32 %v172_v17, %v154_v35  ;;  %v181_v52 = vmul.f32 %v164_v13, %v154_v35  ;;  %v182_v54 = vmul.f32 %v168_v14, %v154_v35 }
  0xb2   :  { %v184_v55 = vmul.f32 %v176_v18, %v154_v35  ;;  %v185_v60 = vmul.f32 %v164_v13, %v158_v34  ;;  %v186_v7 = vmul.f32 %v168_v14, %v158_v34  ;;  %v188_v8 = vmul.f32 %v176_v18, %v158_v34 }
  0xb3   :  { %v195_v50 = vadd.f32 %v187_v42, %v148_v31  ;;  %v191_v56 = vadd.f32 %v183_v43, %v144_v10  ;;  %v189_v16 = vadd.f32 %v181_v52, %v142_v47  ;;  %v190_v17 = vadd.f32 %v182_v54, %v143_v48 }
  0xb4   :  { %v192_v20 = vadd.f32 %v184_v55, %v145_v49  ;;  %v194_v31 = vadd.f32 %v186_v7, %v147_v63  ;;  %v196_v33 = vadd.f32 %v188_v8, %v149_v25 }
  0xb5   :  { %v201_v0 = vpop.permute.xlu1 %200  ;;  %v205_v2 = vpop.permute.xlu0 %204 }
  0xb6   :  { %v228_v3 = vmul.f32 %v211_v19, %v201_v0  ;;  %v229_v4 = vmul.f32 %v215_v21, %v201_v0  ;;  %v230_v53 = vmul.f32 %v219_v22, %v201_v0  ;;  %v231_v5 = vmul.f32 %v223_v23, %v201_v0 }
  0xb7   :  { %v234_v15 = vmul.f32 %v219_v22, %v205_v2  ;;  %v232_v10 = vmul.f32 %v211_v19, %v205_v2  ;;  %v233_v6 = vmul.f32 %v215_v21, %v205_v2  ;;  %v235_v26 = vmul.f32 %v223_v23, %v205_v2 }
  0xb8   :  { %v238_v24 = vadd.f32 %v230_v53, %v191_v56  ;;  %v236_v11 = vadd.f32 %v228_v3, %v189_v16  ;;  %v239_v12 = vadd.f32 %v231_v5, %v192_v20  ;;  %v237_v29 = vadd.f32 %v229_v4, %v190_v17 }
  0xb9   :  { %v242_v9 = vadd.f32 %v234_v15, %v195_v50  ;;  %v193_v22 = vadd.f32 %v185_v60, %v146_v62  ;;  %v300_v19 = vrot.slane %v291_v32, %v1603_v59  ;;  %v241_v40 = vadd.f32 %v233_v6, %v194_v31  ;;  %v1378_v6 = vld [vmem:[#allocation2 + $0x110] ss:$8 sps:$4 sm:$0xff]  }
  0xba   :  { %v248_v28 = vpop.permute.xlu1 %247  ;;  %v243_v41 = vadd.f32 %v235_v26, %v196_v33  ;;  %v1384_v26 = vld [vmem:[#allocation2 + $0x130] ss:$8 sps:$4 sm:$0xff]   ;;  %v1401_v33 = vld [vmem:[#allocation2 + $0x184] ss:$8 sps:$4 sm:$0xff]  }
  0xbb   :  { %v275_v30 = vmul.f32 %v1624_v27, %v248_v28  ;;  %v276_v13 = vmul.f32 %v1630_v36, %v248_v28  ;;  %v277_v14 = vmul.f32 %v1632_v37, %v248_v28  ;;  %v278_v18 = vmul.f32 %v1634_v38, %v248_v28  ;;  %v1389_v28 = vld [vmem:[#allocation2 + $0x144] ss:$8 sps:$4 sm:$0xff]   ;;  %v1396_v31 = vld [vmem:[#allocation2 + $0x170] ss:$8 sps:$4 sm:$0xff]  }
  0xbc   :  { %v240_v23 = vadd.f32 %v232_v10, %v193_v22  ;;  %v1398_v22 = vld [vmem:[#allocation2 + $0x174] ss:$8 sps:$4 sm:$0xff]  }
  0xbd   :  { %v283_v21 = vadd.f32 %v275_v30, %v236_v11  ;;  %v285_v34 = vadd.f32 %v277_v14, %v238_v24  ;;  %v286_v35 = vadd.f32 %v278_v18, %v239_v12  ;;  %v284_v39 = vadd.f32 %v276_v13, %v237_v29  ;;  %v1381_v11 = vld [vmem:[#allocation2 + $0x120] ss:$8 sps:$4 sm:$0xff]   ;;  %v1386_v12 = vld [vmem:[#allocation2 + $0x134] ss:$8 sps:$4 sm:$0xff]   ;;  %v1390_v13 = vld [vmem:[#allocation2 + $0x150] ss:$8 sps:$4 sm:$0xff]  }
  0xbe   :  { %v252_v42 = vpop.permute.xlu1 %251  ;;  %v1387_v29 = vld [vmem:[#allocation2 + $0x140] ss:$8 sps:$4 sm:$0xff]   ;;  %v1392_v30 = vld [vmem:[#allocation2 + $0x154] ss:$8 sps:$4 sm:$0xff]   ;;  %v1395_v14 = vld [vmem:[#allocation2 + $0x164] ss:$8 sps:$4 sm:$0xff]  }
  0xbf   :  { %v279_v43 = vmul.f32 %v1624_v27, %v252_v42  ;;  %v280_v47 = vmul.f32 %v1630_v36, %v252_v42  ;;  %v281_v48 = vmul.f32 %v1632_v37, %v252_v42  ;;  %v282_v49 = vmul.f32 %v1634_v38, %v252_v42  ;;  %v1393_v18 = vld [vmem:[#allocation2 + $0x160] ss:$8 sps:$4 sm:$0xff]  }
  0xc0   :  { %v314_v50 = vadd.f32 %v300_v19, %v284_v39  ;;  %v313_v52 = vadd.f32 %v1637_v44, %v283_v21  ;;  %v316_v59 = vadd.f32 %v1641_v46, %v286_v35  ;;  %v315_v32 = vadd.f32 %v1639_v45, %v285_v34  ;;  %v1404_v21 = vld [vmem:[#allocation2 + $0x194] ss:$8 sps:$4 sm:$0xff]   ;;  %v1402_v34 = vld [vmem:[#allocation2 + $0x190] ss:$8 sps:$4 sm:$0xff]   ;;  %v1407_v35 = vld [vmem:[#allocation2 + $0x1a4] ss:$8 sps:$4 sm:$0xff]  }
  0xc1   :  { %v287_v54 = vadd.f32 %v279_v43, %v240_v23  ;;  %v288_v55 = vadd.f32 %v280_v47, %v241_v40  ;;  %v289_v56 = vadd.f32 %v281_v48, %v242_v9  ;;  %v290_v58 = vadd.f32 %v282_v49, %v243_v41  ;;  %v1383_v9 = vld [vmem:[#allocation2 + $0x124] ss:$8 sps:$4 sm:$0xff]   ;;  %v1405_v39 = vld [vmem:[#allocation2 + $0x1a0] ss:$8 sps:$4 sm:$0xff]   ;;  %v1410_v23 = vld [vmem:[#allocation2 + $0x1b4] ss:$8 sps:$4 sm:$0xff]  }
  0xc2   :  { %v322_v61 = vmul.f32 0.01, %v314_v50  ;;  %v321_v62 = vmul.f32 0.01, %v313_v52  ;;  %v324_v63 = vmul.f32 0.01, %v316_v59 }
  0xc3   :  { %v317_v27 = vadd.f32 %v1637_v44, %v287_v54  ;;  %v319_v36 = vadd.f32 %v1639_v45, %v289_v56  ;;  %v320_v37 = vadd.f32 %v1641_v46, %v290_v58  ;;  %v318_v38 = vadd.f32 %v300_v19, %v288_v55  ;;  %v1375_v44 = vld [vmem:[#allocation2 + $0x100] ss:$8 sps:$4 sm:$0xff]   ;;  %v1380_v46 = vld [vmem:[#allocation2 + $0x114] ss:$8 sps:$4 sm:$0xff]   ;;  %v1408_v40 = vld [vmem:[#allocation2 + $0x1b0] ss:$8 sps:$4 sm:$0xff]  }
  0xc4   :  { %v323_v0 = vmul.f32 0.01, %v315_v32  ;;  %v330_v53 = vmax.f32 %v314_v50, %v322_v61  ;;  %v329_v5 = vmax.f32 %v313_v52, %v321_v62  ;;  %v332_v45 = vmax.f32 %v316_v59, %v324_v63  ;;  %v1399_v19 = vld [vmem:[#allocation2 + $0x180] ss:$8 sps:$4 sm:$0xff]   ;;  %v1413_v41 = vld [vmem:[#allocation2 + $0x1c4] ss:$8 sps:$4 sm:$0xff]  }
  0xc5   :  { %v327_v2 = vmul.f32 0.01, %v319_v36  ;;  %v326_v3 = vmul.f32 0.01, %v318_v38  ;;  %v325_v4 = vmul.f32 0.01, %v317_v27 }
  0xc6   :  { %v328_v60 = vmul.f32 0.01, %v320_v37  ;;  %v331_v15 = vmax.f32 %v315_v32, %v323_v0  ;;  %v1411_v42 = vld [vmem:[#allocation2 + $0x1c0] ss:$8 sps:$4 sm:$0xff]   ;;  %v1416_v43 = vld [vmem:[#allocation2 + $0x1d4] ss:$8 sps:$4 sm:$0xff]  }
  0xc7   :  { %v334_v7 = vmax.f32 %v318_v38, %v326_v3  ;;  %v333_v8 = vmax.f32 %v317_v27, %v325_v4  ;;  %v335_v16 = vmax.f32 %v319_v36, %v327_v2  ;;  %v1414_v47 = vld [vmem:[#allocation2 + $0x1d0] ss:$8 sps:$4 sm:$0xff]   ;;  %v1419_v48 = vld [vmem:[#allocation2 + $0x1e4] ss:$8 sps:$4 sm:$0xff]   ;;  %v1417_v49 = vld [vmem:[#allocation2 + $0x1e0] ss:$8 sps:$4 sm:$0xff]  }
  0xc8   :  { %v336_v17 = vmax.f32 %v320_v37, %v328_v60  ;;  %v1422_v50 = vld [vmem:[#allocation2 + $0x1f4] ss:$8 sps:$4 sm:$0xff]   ;;  %v1420_v52 = vld [vmem:[#allocation2 + $0x1f0] ss:$8 sps:$4 sm:$0xff]   ;;  %v1434_v59 = vld [vmem:[#allocation4 + $0x28] sm:$0xff]   ;;  %v1506_v58 = vmov 0.0  }
  0xc9   :  { %v338_v20 = vpack.c.bf16 %v334_v7, %v330_v53  ;;  %v337_v24 = vpack.c.bf16 %v333_v8, %v329_v5  ;;  %v1658_v25 = vpack.c.bf16 %v335_v16, %v331_v15  ;;  %1261 = vmatpush3.bf16.msra.mxu1 %v1434_v59  ;;  %v1435_v32 = vld [vmem:[#allocation4 + $0x70] sm:$0xff]   ;;  %v1437_v55 = vld [vmem:[#allocation4 + $0x78] sm:$0xff]   ;;  %v1507_v61 = vmov 1966171168  }
  0xca   :  { %v340_v10 = vpack.c.bf16 %v336_v17, %v332_v45  ;;  %v1436_v54 = vld [vmem:[#allocation4 + $0x30] sm:$0xff]   ;;  %1262 = vmatprep.subr.bf16.mxu1 %v1435_v32  ;;  %v1438_v56 = vld [vmem:[#allocation4 + $0x38] sm:$0xff]   ;;  %v824_v62 = vunpack.c.l.s4 %v1507_v61  ;;  %v1224_v36 = vld.sshfl [vmem:[%s1711_s4] sm:$0x11 pattern:$0x75316420] }
  0xcb   :  { %757 = vmatprep.mubr.bf16.mxu0 %v338_v20  ;;  %v822_v38 = vcombine.high %v1224_v36, %v1224_v36  ;;  %v1440_v45 = vld [vmem:[%s1714_s7 + $0x8] sm:$0xff]  }
  0xcc   :  { %758 = vmatmul.mubr.bf16.vlgmr.msra.gmra.mrb[0].mxu0 %v337_v24  ;;  %v825_v27 = vunpack.c.0.s8 %v824_v62 }
  0xcd   :  { %769 = vmatpush1.bf16.msra.mxu0 %v1375_v44  ;;  %800 = vmatprep.mubr.bf16.mxu0 %v340_v10  ;;  %v1443_v10 = vld [vmem:[%s1714_s7 + $0x20] sm:$0xff]  }
  0xce   :  { %770 = vmatprep.subr.bf16.mxu0 %v1380_v46  ;;  %1263 = vmatpush3.bf16.msra.mxu1 %v1436_v54  ;;  %v828_v37 = vsub.s32 %v825_v27, %v1590_v51  ;;  %v1439_v51 = vld [vmem:[%s1714_s7] sm:$0xff]   ;;  %v1442_v46 = vld [vmem:[%s1714_s7 + $0x18] sm:$0xff]  }
  0xcf   :  { %1264 = vmatprep.subr.bf16.mxu1 %v1437_v55 }
  0xd0   :  { %v829_v63 = vrot.slane %v1224_v36, %v828_v37  ;;  %v836_v0 = vrot.slane %v822_v38, %v828_v37 }
  0xd1   :  { %771 = vmatpush1.bf16.msra.mxu0 %v1378_v6  ;;  %v1444_v6 = vld [vmem:[%s1714_s7 + $0x28] sm:$0xff]  }
  0xd2   :  { %772 = vmatprep.subr.bf16.mxu0 %v1383_v9  ;;  %1265 = vmatpush3.bf16.msra.mxu1 %v1438_v56  ;;  %v838_v2 = vpack.i.b16 %v829_v63, %v829_v63  ;;  %v845_v3 = vpack.i.b16 %v836_v0, %v836_v0  ;;  %v1445_v9 = vld [vmem:[%s1714_s7 + $0x30] sm:$0xff]  }
  0xd3   :  { %1281 = vmatprep.subr.bf16.mxu1 %v1506_v58 }
  0xd4   :  { %v843_v5 = vrot.slane %v838_v2, %v1600_v57  ;;  %v850_v7 = vrot.slane %v845_v3, %v1600_v57 }
  0xd5   :  { %773 = vmatpush1.bf16.msra.mxu0 %v1381_v11  ;;  %v1446_v11 = vld [vmem:[%s1714_s7 + $0x38] sm:$0xff]  }
  0xd6   :  { %774 = vmatprep.subr.bf16.mxu0 %v1386_v12  ;;  %v1025_v12 = vld [vmem:[%s1713_s6] sm:$0x1] }
  0xd9   :  { %775 = vmatpush1.bf16.msra.mxu0 %v1384_v26 }
  0xda   :  { %776 = vmatprep.subr.bf16.mxu0 %v1389_v28  ;;  %v1027_v28 = vpack.i.b16 %v1025_v12, %v1025_v12 }
  0xdd   :  { %777 = vmatpush1.bf16.msra.mxu0 %v1387_v29 }
  0xde   :  { %778 = vmatprep.subr.bf16.mxu0 %v1392_v30 }
  0xe1   :  { %779 = vmatpush1.bf16.msra.mxu0 %v1390_v13 }
  0xe2   :  { %780 = vmatprep.subr.bf16.mxu0 %v1395_v14 }
  0xe5   :  { %781 = vmatpush1.bf16.msra.mxu0 %v1393_v18 }
  0xe6   :  { %782 = vmatprep.subr.bf16.mxu0 %v1398_v22  ;;  %v1032_v22 = vrot.slane %v1027_v28, %v1600_v57 }
  0xe9   :  { %783 = vmatpush1.bf16.msra.mxu0 %v1396_v31 }
  0xea   :  { %784 = vmatprep.subr.bf16.mxu0 %v1401_v33 }
  0xed   :  { %785 = vmatpush1.bf16.msra.mxu0 %v1399_v19 }
  0xee   :  { %786 = vmatprep.subr.bf16.mxu0 %v1404_v21  ;;  %v1241_v21 = vld [vmem:[%s1715_s8] ss:$0 sm:$0xff] }
  0xf1   :  { %787 = vmatpush1.bf16.msra.mxu0 %v1402_v34 }
  0xf2   :  { %788 = vmatprep.subr.bf16.mxu0 %v1407_v35 }
  0xf5   :  { %789 = vmatpush1.bf16.msra.mxu0 %v1405_v39 }
  0xf6   :  { %790 = vmatprep.subr.bf16.mxu0 %v1410_v23 }
  0xf9   :  { %791 = vmatpush1.bf16.msra.mxu0 %v1408_v40 }
  0xfa   :  { %792 = vmatprep.subr.bf16.mxu0 %v1413_v41 }
  0xfd   :  { %793 = vmatpush1.bf16.msra.mxu0 %v1411_v42 }
  0xfe   :  { %794 = vmatprep.subr.bf16.mxu0 %v1416_v43 }
 0x101   :  { %795 = vmatpush1.bf16.msra.mxu0 %v1414_v47 }
 0x102   :  { %796 = vmatprep.subr.bf16.mxu0 %v1419_v48 }
 0x105   :  { %797 = vmatpush1.bf16.msra.mxu0 %v1417_v49 }
 0x106   :  { %798 = vmatprep.subr.bf16.mxu0 %v1422_v50 }
 0x109   :  { %799 = vmatpush1.bf16.msra.mxu0 %v1420_v52 }
 0x10c   :  { %801 = vmatmul.mubr.bf16.vlgmr.msra.gmra.mrb[0].mxu0 %v1658_v25  ;;  %v1441_v25 = vld [vmem:[%s1714_s7 + $0x10] sm:$0xff]  }
 0x1df   :  { %v802_v4 = vpop.f32.mrb[0].mxu0 }
 0x1e0   :  { %v804_v53 = vpop.f32.mrb[1].mxu0 }
 0x1e1   :  { %v806_v60 = vpop.f32.mrb[2].mxu0 }
 0x1e2   :  { %v811_v8 = vpack.c.bf16 %v806_v60, %v802_v4  ;;  %v808_v15 = vpop.f32.mrb[3].mxu0 }
 0x1e3   :  { %v812_v16 = vpack.c.bf16 %v808_v15, %v804_v53 }
 0x1e4   :  { %v851_v17 = vadd.bf16 %v843_v5, %v811_v8 }
 0x1e5   :  { %v852_v20 = vadd.bf16 %v850_v7, %v812_v16 }
 0x1e6   :  { %v853_v24 = vmax.bf16 %v1502_v1, %v851_v17 }
 0x1e7   :  { %v854_v44 = vmax.bf16 %v1502_v1, %v852_v20 }
 0x1e9   :  { %1015 = vmatprep.mubr.bf16.mxu1 %v854_v44 }
 0x1ea   :  { %1016 = vmatmul.mubr.bf16.vlgmr.msra.gmra.mrb[0].mxu1 %v853_v24 }
 0x1eb   :  { %1282 = vmatpush3.bf16.msra.mxu1 %v1439_v51  ;;  %1297 = vmatprep.mubr.msk.bf16.mxu1 %vm1508_vm0, %v1506_v58 }
 0x1ec   :  { %1283 = vmatprep.subr.bf16.mxu1 %v1506_v58 }
 0x1ef   :  { %1284 = vmatpush3.bf16.msra.mxu1 %v1440_v45 }
 0x1f0   :  { %1285 = vmatprep.subr.bf16.mxu1 %v1506_v58 }
 0x1f3   :  { %1286 = vmatpush3.bf16.msra.mxu1 %v1441_v25 }
 0x1f4   :  { %1287 = vmatprep.subr.bf16.mxu1 %v1506_v58 }
 0x1f7   :  { %1288 = vmatpush3.bf16.msra.mxu1 %v1442_v46 }
 0x1f8   :  { %1289 = vmatprep.subr.bf16.mxu1 %v1506_v58 }
 0x1fb   :  { %1290 = vmatpush3.bf16.msra.mxu1 %v1443_v10 }
 0x1fc   :  { %1291 = vmatprep.subr.bf16.mxu1 %v1506_v58 }
 0x1ff   :  { %1292 = vmatpush3.bf16.msra.mxu1 %v1444_v6 }
 0x200   :  { %1293 = vmatprep.subr.bf16.mxu1 %v1506_v58 }
 0x203   :  { %1294 = vmatpush3.bf16.msra.mxu1 %v1445_v9 }
 0x204   :  { %1295 = vmatprep.subr.bf16.mxu1 %v1506_v58 }
 0x207   :  { %1296 = vmatpush3.bf16.msra.mxu1 %v1446_v11 }
 0x2bd   :  { %v1266_v26 = vpop.f32.mrb[0].mxu1 }
 0x2be   :  { %v1267_v29 = vpop.f32.mrb[1].mxu1 }
 0x2bf   :  { %v1268_v30 = vadd.f32 %v1267_v29, %v1266_v26  ;;  %v1269_v13 = vpop.f32.mrb[2].mxu1 }
 0x2c0   :  { %v1270_v14 = vpop.f32.mrb[3].mxu1 }
 0x2c1   :  { %v1271_v18 = vadd.f32 %v1270_v14, %v1269_v13 }
 0x2c3   :  { %v1024_v31 = vpack.c.bf16 %v1271_v18, %v1268_v30 }
 0x2c5   :  { %v1033_v33 = vadd.bf16 %v1032_v22, %v1024_v31 }
 0x2c7   :  { %v1034_v19 = vmax.bf16 %v1502_v1, %v1033_v33 }
 0x2c9   :  { %1298 = vmatmul.mubr.bf16.vlgmr.msra.gmra.mrb[4].mxu1 %v1034_v19 }
 0x39c   :  { %v1140_v34 = vpop.f32.mrb[4].mxu1 }
 0x39d   :  { %v1141_v35 = vadd.f32 %v1241_v21, %v1140_v34  ;;  %v1299_v39 = vpop.f32.mrb[5].mxu1 }
 0x39e   :  { %v1143_v23 = vpop.f32.mrb[6].mxu1 }
 0x39f   :  { %1148 = vst.msk [vmem:[%s1716_s9] sm:$0xff] %vm1147_vm1, %v1141_v35  ;;  %v1144_v40 = vadd.f32 %v1241_v21, %v1143_v23  ;;  %v1300_v57 = vpop.f32.mrb[7].mxu1 }
 0x3a1   :  { %1149 = vst.msk [vmem:[%s1716_s9 + $0x8] sm:$0xff] %vm1147_vm1, %v1144_v40 }
 0x3a2   :  { %1154 = vsyncpa [#allocation3], 1 }
 0x3a3   :  { %1155 = vsyncpa [#allocation5], 1 }

</bundles_post_ra>
